<compile_context>
chip_gen: v7x
topology: tpu7x:2x2x1
jax: 0.10.0
libtpu: 0.0.40
codegen_flags: <defaults>
</compile_context>

<pallas_src>
import numpy as np
import jax
import jax.numpy as jnp
from jax.experimental import pallas as pl
from jax.experimental.pallas import tpu as pltpu

EPS = 1e-5


def conv_block_kernel(xp_ref, w1_ref, g1_ref, be1_ref,
                      w2_ref, g2_ref, be2_ref, gmat_ref, gmatt_ref,
                      o_ref, pad_ref):
    N, Hp, _ = xp_ref.shape
    H = Hp - 2
    _, _, WCout = o_ref.shape
    Cout = g1_ref.shape[1]
    W = WCout // Cout
    inv_count = 1.0 / float(N * H * W)

    def row_conv(src_ref, wbig_ref):
        # src_ref: (N, H+2, W*Cin_any), H-padded, rows flattened as (w, c) on lanes.
        # im2col over the 3 kernel rows only; the 3 column taps + W zero-padding
        # live inside the block-Toeplitz weight -> one fat MXU matmul.
        lhs = jnp.concatenate(
            [src_ref[:, dy:dy + H, :].reshape(N * H, src_ref.shape[-1])
             for dy in range(3)],
            axis=1)                                              # (N*H, 3*W*Cin)
        return jnp.dot(lhs, wbig_ref[...],
                       preferred_element_type=jnp.float32)       # (N*H, W*Cout)

    def bn_relu(y, g_ref, be_ref):
        # Training-mode BatchNorm2d fused to y*scale + shift, then ReLU.
        # Lane axis is (w, cout)-interleaved -> group reduce / re-broadcast per
        # channel with tiny indicator matmuls (gmat: (W*Cout, Cout), gmatt: its T).
        col_s = jnp.sum(y, axis=0, keepdims=True)                # (1, W*Cout)
        col_sq = jnp.sum(y * y, axis=0, keepdims=True)           # (1, W*Cout)
        ch_s = jnp.dot(col_s, gmat_ref[...],
                       preferred_element_type=jnp.float32)       # (1, Cout)
        ch_sq = jnp.dot(col_sq, gmat_ref[...],
                        preferred_element_type=jnp.float32)      # (1, Cout)
        mean = ch_s * inv_count
        var = ch_sq * inv_count - mean * mean                    # biased variance
        scale = g_ref[...] * jax.lax.rsqrt(var + EPS)            # (1, Cout)
        shift = be_ref[...] - mean * scale                       # (1, Cout)
        scale_row = jnp.dot(scale, gmatt_ref[...],
                            preferred_element_type=jnp.float32)  # (1, W*Cout)
        shift_row = jnp.dot(shift, gmatt_ref[...],
                            preferred_element_type=jnp.float32)  # (1, W*Cout)
        return jnp.maximum(y * scale_row + shift_row, 0.0)       # (N*H, W*Cout)

    # conv1 -> bn1 -> relu, written straight into the H-padded scratch for conv2.
    y1 = bn_relu(row_conv(xp_ref, w1_ref), g1_ref, be1_ref)
    pad_ref[:, 0:1, :] = jnp.zeros((N, 1, WCout), jnp.float32)          # top halo
    pad_ref[:, H + 1:H + 2, :] = jnp.zeros((N, 1, WCout), jnp.float32)  # bottom halo
    pad_ref[:, 1:H + 1, :] = y1.reshape(N, H, WCout)                    # interior

    # conv2 -> bn2 -> relu -> lane-dense output.
    y2 = bn_relu(row_conv(pad_ref, w2_ref), g2_ref, be2_ref)
    o_ref[...] = y2.reshape(N, H, WCout)


def _toeplitz_weight(w_oihw, W):
    """PyTorch conv weight (Cout, Cin, 3, 3) -> (3*W*Cin, W*Cout) block-Toeplitz
    matrix: one spatial row of the 3x3 conv (including W zero-padding) becomes a
    single matmul against the H-shifted input rows."""
    w = np.asarray(w_oihw)
    Cout, Cin, KH, KW = w.shape
    wk = np.transpose(w, (2, 3, 1, 0))                    # (KH, KW, Cin, Cout)
    big = np.zeros((KH, W * Cin, W * Cout), np.float32)
    for dx in range(KW):
        for wo in range(W):
            wi = wo + dx - 1
            if 0 <= wi < W:
                big[:, wi * Cin:(wi + 1) * Cin, wo * Cout:(wo + 1) * Cout] = wk[:, dx]
    return jnp.asarray(big.reshape(KH * W * Cin, W * Cout))


def _group_matrices(W, Cout):
    """Indicator matrices mapping the (w, cout) lane axis <-> channels."""
    g = np.zeros((W * Cout, Cout), np.float32)
    for w in range(W):
        g[w * Cout:(w + 1) * Cout, :] = np.eye(Cout, dtype=np.float32)
    return jnp.asarray(g), jnp.asarray(np.ascontiguousarray(g.T))


def conv_block_forward(x_nchw, params):
    """x_nchw: (N, Cin, H, W) float32. Returns (N, Cout, H, W) float32."""
    # Conv biases b1/b2 are intentionally unused: a per-channel bias added right
    # before training-mode BatchNorm is exactly cancelled by the mean subtraction.
    w1, _b1, g1, be1, w2, _b2, g2, be2 = params
    N, Cin, H, W = x_nchw.shape
    Cout = w1.shape[0]
    WCin, WCout = W * Cin, W * Cout

    # NCHW -> (N, H, W*Cin) row-flattened layout; pad only H by 1 (W padding is
    # folded into the block-Toeplitz weights).
    x_rows = jnp.transpose(x_nchw, (0, 2, 3, 1)).reshape(N, H, WCin)
    xp = jnp.pad(x_rows, ((0, 0), (1, 1), (0, 0)))

    w1_big = _toeplitz_weight(w1, W)          # (3*W*Cin,  W*Cout)
    w2_big = _toeplitz_weight(w2, W)          # (3*W*Cout, W*Cout)
    gmat, gmat_t = _group_matrices(W, Cout)   # (W*Cout, Cout), (Cout, W*Cout)

    args = (xp, w1_big, g1.reshape(1, -1), be1.reshape(1, -1),
            w2_big, g2.reshape(1, -1), be2.reshape(1, -1), gmat, gmat_t)

    f32 = jnp.dtype(jnp.float32).itemsize
    resident = (sum(int(np.prod(a.shape)) for a in args)
                + N * H * WCout + N * (H + 2) * WCout) * f32
    vmem_budget = int(min(max(4 * resident, 8 << 20), 64 << 20))

    vmem = pl.BlockSpec(memory_space=pltpu.MemorySpace.VMEM)
    out = pl.pallas_call(
        conv_block_kernel,
        out_shape=jax.ShapeDtypeStruct((N, H, WCout), jnp.float32),
        in_specs=[vmem] * len(args),
        out_specs=vmem,
        scratch_shapes=[pltpu.VMEM((N, H + 2, WCout), jnp.float32)],
        compiler_params=pltpu.CompilerParams(vmem_limit_bytes=vmem_budget),
    )(*args)

    # (N, H, W*Cout) -> NCHW
    return jnp.transpose(out.reshape(N, H, W, Cout), (0, 3, 1, 2))


def conv_block_reference(x_nchw, params):
    """Pure-JAX reference (PyTorch training-mode BN semantics, with conv bias)."""
    w1, b1, g1, be1, w2, b2, g2, be2 = params

    def conv(x, w, b):
        y = jax.lax.conv_general_dilated(
            x, w, window_strides=(1, 1), padding=((1, 1), (1, 1)),
            dimension_numbers=("NCHW", "OIHW", "NCHW"))
        return y + b[None, :, None, None]

    def bn_relu(x, g, be):
        mean = jnp.mean(x, axis=(0, 2, 3), keepdims=True)
        var = jnp.mean((x - mean) ** 2, axis=(0, 2, 3), keepdims=True)
        y = (x - mean) * jax.lax.rsqrt(var + EPS)
        y = y * g[None, :, None, None] + be[None, :, None, None]
        return jnp.maximum(y, 0.0)

    x = bn_relu(conv(x_nchw, w1, b1), g1, be1)
    x = bn_relu(conv(x, w2, b2), g2, be2)
    return x


def make_params(key, in_ch, out_ch):
    k1, k2, k3, k4 = jax.random.split(key, 4)
    w1 = jax.random.normal(k1, (out_ch, in_ch, 3, 3), jnp.float32) * 0.1
    b1 = jax.random.normal(k2, (out_ch,), jnp.float32) * 0.1
    w2 = jax.random.normal(k3, (out_ch, out_ch, 3, 3), jnp.float32) * 0.1
    b2 = jax.random.normal(k4, (out_ch,), jnp.float32) * 0.1
    # BatchNorm2d default affine init: weight=1, bias=0
    g1 = jnp.ones((out_ch,), jnp.float32)
    be1 = jnp.zeros((out_ch,), jnp.float32)
    g2 = jnp.ones((out_ch,), jnp.float32)
    be2 = jnp.zeros((out_ch,), jnp.float32)
    return (w1, b1, g1, be1, w2, b2, g2, be2)


if __name__ == "__main__":
    N, Cin, Cout, H, W = 2, 4, 8, 16, 16
    key = jax.random.PRNGKey(0)
    kx, kp = jax.random.split(key)
    x = jax.random.normal(kx, (N, Cin, H, W), jnp.float32)
    params = make_params(kp, Cin, Cout)

    out = jax.block_until_ready(conv_block_forward(x, params))

    ref = conv_block_reference(x, params)
    assert out.shape == (N, Cout, H, W)
    assert jnp.allclose(out, ref, atol=1e-4, rtol=1e-4), "mismatch vs reference"

    print("KERNEL_OK")
</pallas_src>

<mosaic_0001>
module attributes {stable_mosaic.version = 11 : i64} {
  func.func @conv_block_kernel(%arg0: memref<2x18x64xf32, #tpu.memory_space<vmem>>, %arg1: memref<192x128xf32, #tpu.memory_space<vmem>>, %arg2: memref<1x8xf32, #tpu.memory_space<vmem>>, %arg3: memref<1x8xf32, #tpu.memory_space<vmem>>, %arg4: memref<384x128xf32, #tpu.memory_space<vmem>>, %arg5: memref<1x8xf32, #tpu.memory_space<vmem>>, %arg6: memref<1x8xf32, #tpu.memory_space<vmem>>, %arg7: memref<128x8xf32, #tpu.memory_space<vmem>>, %arg8: memref<8x128xf32, #tpu.memory_space<vmem>>, %arg9: memref<2x16x128xf32, #tpu.memory_space<vmem>>, %arg10: memref<2x18x128xf32, #tpu.memory_space<vmem>>) attributes {dimension_semantics = [], scalar_prefetch = 0 : i64, scratch_operands = 1 : i64, tpu.core_type = #tpu.core_type<tc>} {
    %c0 = arith.constant 0 : index
    %c0_0 = arith.constant 0 : index
    %c0_1 = arith.constant 0 : index
    %0 = vector.load %arg0[%c0, %c0_0, %c0_1] : memref<2x18x64xf32, #tpu.memory_space<vmem>>, vector<2x16x64xf32>
    %1 = vector.shape_cast %0 : vector<2x16x64xf32> to vector<32x64xf32>
    %c0_2 = arith.constant 0 : index
    %c1 = arith.constant 1 : index
    %c0_3 = arith.constant 0 : index
    %2 = vector.load %arg0[%c0_2, %c1, %c0_3] : memref<2x18x64xf32, #tpu.memory_space<vmem>>, vector<2x16x64xf32>
    %3 = vector.shape_cast %2 : vector<2x16x64xf32> to vector<32x64xf32>
    %c0_4 = arith.constant 0 : index
    %c2 = arith.constant 2 : index
    %c0_5 = arith.constant 0 : index
    %4 = vector.load %arg0[%c0_4, %c2, %c0_5] : memref<2x18x64xf32, #tpu.memory_space<vmem>>, vector<2x16x64xf32>
    %5 = vector.shape_cast %4 : vector<2x16x64xf32> to vector<32x64xf32>
    %6 = tpu.concatenate %1, %3, %5 in 1 : vector<32x64xf32>, vector<32x64xf32>, vector<32x64xf32> -> vector<32x192xf32>
    %c0_6 = arith.constant 0 : index
    %c0_7 = arith.constant 0 : index
    %7 = vector.load %arg1[%c0_6, %c0_7] : memref<192x128xf32, #tpu.memory_space<vmem>>, vector<192x128xf32>
    %cst = arith.constant dense<0.000000e+00> : vector<32x128xf32>
    %8 = tpu.matmul %6, %7, %cst {dimension_numbers = #tpu.dot_dimension_numbers<[1], [0], [0], [1], [0, 0, 1, 1], [], []>} : vector<32x192xf32>, vector<192x128xf32>, vector<32x128xf32> -> vector<32x128xf32>
    %cst_8 = arith.constant dense<0.000000e+00> : vector<128xf32>
    %9 = vector.multi_reduction <add>, %8, %cst_8 [0] : vector<32x128xf32> to vector<128xf32>
    %10 = vector.shape_cast %9 : vector<128xf32> to vector<1x128xf32>
    %11 = arith.mulf %8, %8 : vector<32x128xf32>
    %cst_9 = arith.constant dense<0.000000e+00> : vector<128xf32>
    %12 = vector.multi_reduction <add>, %11, %cst_9 [0] : vector<32x128xf32> to vector<128xf32>
    %13 = vector.shape_cast %12 : vector<128xf32> to vector<1x128xf32>
    %c0_10 = arith.constant 0 : index
    %c0_11 = arith.constant 0 : index
    %14 = vector.load %arg7[%c0_10, %c0_11] : memref<128x8xf32, #tpu.memory_space<vmem>>, vector<128x8xf32>
    %cst_12 = arith.constant dense<0.000000e+00> : vector<1x8xf32>
    %15 = tpu.matmul %10, %14, %cst_12 {dimension_numbers = #tpu.dot_dimension_numbers<[1], [0], [0], [1], [0, 0, 1, 1], [], []>} : vector<1x128xf32>, vector<128x8xf32>, vector<1x8xf32> -> vector<1x8xf32>
    %c0_13 = arith.constant 0 : index
    %c0_14 = arith.constant 0 : index
    %16 = vector.load %arg7[%c0_13, %c0_14] : memref<128x8xf32, #tpu.memory_space<vmem>>, vector<128x8xf32>
    %cst_15 = arith.constant dense<0.000000e+00> : vector<1x8xf32>
    %17 = tpu.matmul %13, %16, %cst_15 {dimension_numbers = #tpu.dot_dimension_numbers<[1], [0], [0], [1], [0, 0, 1, 1], [], []>} : vector<1x128xf32>, vector<128x8xf32>, vector<1x8xf32> -> vector<1x8xf32>
    %cst_16 = arith.constant 0.001953125 : f32
    %18 = vector.broadcast %cst_16 : f32 to vector<1x8xf32>
    %19 = arith.mulf %15, %18 : vector<1x8xf32>
    %cst_17 = arith.constant 0.001953125 : f32
    %20 = vector.broadcast %cst_17 : f32 to vector<1x8xf32>
    %21 = arith.mulf %17, %20 : vector<1x8xf32>
    %22 = arith.mulf %19, %19 : vector<1x8xf32>
    %23 = arith.subf %21, %22 : vector<1x8xf32>
    %c0_18 = arith.constant 0 : index
    %c0_19 = arith.constant 0 : index
    %24 = vector.load %arg2[%c0_18, %c0_19] : memref<1x8xf32, #tpu.memory_space<vmem>>, vector<1x8xf32>
    %cst_20 = arith.constant 9.99999974E-6 : f32
    %25 = vector.broadcast %cst_20 : f32 to vector<1x8xf32>
    %26 = arith.addf %23, %25 : vector<1x8xf32>
    %27 = math.rsqrt %26 : vector<1x8xf32>
    %28 = arith.mulf %24, %27 : vector<1x8xf32>
    %c0_21 = arith.constant 0 : index
    %c0_22 = arith.constant 0 : index
    %29 = vector.load %arg3[%c0_21, %c0_22] : memref<1x8xf32, #tpu.memory_space<vmem>>, vector<1x8xf32>
    %30 = arith.mulf %19, %28 : vector<1x8xf32>
    %31 = arith.subf %29, %30 : vector<1x8xf32>
    %c0_23 = arith.constant 0 : index
    %c0_24 = arith.constant 0 : index
    %32 = vector.load %arg8[%c0_23, %c0_24] : memref<8x128xf32, #tpu.memory_space<vmem>>, vector<8x128xf32>
    %cst_25 = arith.constant dense<0.000000e+00> : vector<1x128xf32>
    %33 = tpu.matmul %28, %32, %cst_25 {dimension_numbers = #tpu.dot_dimension_numbers<[1], [0], [0], [1], [0, 0, 1, 1], [], []>} : vector<1x8xf32>, vector<8x128xf32>, vector<1x128xf32> -> vector<1x128xf32>
    %c0_26 = arith.constant 0 : index
    %c0_27 = arith.constant 0 : index
    %34 = vector.load %arg8[%c0_26, %c0_27] : memref<8x128xf32, #tpu.memory_space<vmem>>, vector<8x128xf32>
    %cst_28 = arith.constant dense<0.000000e+00> : vector<1x128xf32>
    %35 = tpu.matmul %31, %34, %cst_28 {dimension_numbers = #tpu.dot_dimension_numbers<[1], [0], [0], [1], [0, 0, 1, 1], [], []>} : vector<1x8xf32>, vector<8x128xf32>, vector<1x128xf32> -> vector<1x128xf32>
    %36 = vector.broadcast %33 : vector<1x128xf32> to vector<32x128xf32>
    %37 = arith.mulf %8, %36 : vector<32x128xf32>
    %38 = vector.broadcast %35 : vector<1x128xf32> to vector<32x128xf32>
    %39 = arith.addf %37, %38 : vector<32x128xf32>
    %cst_29 = arith.constant 0.000000e+00 : f32
    %40 = vector.broadcast %cst_29 : f32 to vector<32x128xf32>
    %41 = arith.maximumf %39, %40 : vector<32x128xf32>
    %cst_30 = arith.constant 0.000000e+00 : f32
    %42 = vector.broadcast %cst_30 : f32 to vector<2x1x128xf32>
    %c0_31 = arith.constant 0 : index
    %c0_32 = arith.constant 0 : index
    %c0_33 = arith.constant 0 : index
    %43 = vector.load %arg10[%c0_31, %c0_32, %c0_33] : memref<2x18x128xf32, #tpu.memory_space<vmem>>, vector<2x1x128xf32>
    tpu.vector_store %arg10[%c0_31, %c0_32, %c0_33], %42 {strides = array<i32>} : memref<2x18x128xf32, #tpu.memory_space<vmem>>, vector<2x1x128xf32>,
    %cst_34 = arith.constant 0.000000e+00 : f32
    %44 = vector.broadcast %cst_34 : f32 to vector<2x1x128xf32>
    %c0_35 = arith.constant 0 : index
    %c17 = arith.constant 17 : index
    %c0_36 = arith.constant 0 : index
    %45 = vector.load %arg10[%c0_35, %c17, %c0_36] : memref<2x18x128xf32, #tpu.memory_space<vmem>>, vector<2x1x128xf32>
    tpu.vector_store %arg10[%c0_35, %c17, %c0_36], %44 {strides = array<i32>} : memref<2x18x128xf32, #tpu.memory_space<vmem>>, vector<2x1x128xf32>,
    %46 = vector.shape_cast %41 : vector<32x128xf32> to vector<2x16x128xf32>
    %c0_37 = arith.constant 0 : index
    %c1_38 = arith.constant 1 : index
    %c0_39 = arith.constant 0 : index
    %47 = vector.load %arg10[%c0_37, %c1_38, %c0_39] : memref<2x18x128xf32, #tpu.memory_space<vmem>>, vector<2x16x128xf32>
    tpu.vector_store %arg10[%c0_37, %c1_38, %c0_39], %46 {strides = array<i32>} : memref<2x18x128xf32, #tpu.memory_space<vmem>>, vector<2x16x128xf32>,
    %c0_40 = arith.constant 0 : index
    %c0_41 = arith.constant 0 : index
    %c0_42 = arith.constant 0 : index
    %48 = vector.load %arg10[%c0_40, %c0_41, %c0_42] : memref<2x18x128xf32, #tpu.memory_space<vmem>>, vector<2x16x128xf32>
    %49 = vector.shape_cast %48 : vector<2x16x128xf32> to vector<32x128xf32>
    %c0_43 = arith.constant 0 : index
    %c1_44 = arith.constant 1 : index
    %c0_45 = arith.constant 0 : index
    %50 = vector.load %arg10[%c0_43, %c1_44, %c0_45] : memref<2x18x128xf32, #tpu.memory_space<vmem>>, vector<2x16x128xf32>
    %51 = vector.shape_cast %50 : vector<2x16x128xf32> to vector<32x128xf32>
    %c0_46 = arith.constant 0 : index
    %c2_47 = arith.constant 2 : index
    %c0_48 = arith.constant 0 : index
    %52 = vector.load %arg10[%c0_46, %c2_47, %c0_48] : memref<2x18x128xf32, #tpu.memory_space<vmem>>, vector<2x16x128xf32>
    %53 = vector.shape_cast %52 : vector<2x16x128xf32> to vector<32x128xf32>
    %54 = tpu.concatenate %49, %51, %53 in 1 : vector<32x128xf32>, vector<32x128xf32>, vector<32x128xf32> -> vector<32x384xf32>
    %c0_49 = arith.constant 0 : index
    %c0_50 = arith.constant 0 : index
    %55 = vector.load %arg4[%c0_49, %c0_50] : memref<384x128xf32, #tpu.memory_space<vmem>>, vector<384x128xf32>
    %cst_51 = arith.constant dense<0.000000e+00> : vector<32x128xf32>
    %56 = tpu.matmul %54, %55, %cst_51 {dimension_numbers = #tpu.dot_dimension_numbers<[1], [0], [0], [1], [0, 0, 1, 1], [], []>} : vector<32x384xf32>, vector<384x128xf32>, vector<32x128xf32> -> vector<32x128xf32>
    %cst_52 = arith.constant dense<0.000000e+00> : vector<128xf32>
    %57 = vector.multi_reduction <add>, %56, %cst_52 [0] : vector<32x128xf32> to vector<128xf32>
    %58 = vector.shape_cast %57 : vector<128xf32> to vector<1x128xf32>
    %59 = arith.mulf %56, %56 : vector<32x128xf32>
    %cst_53 = arith.constant dense<0.000000e+00> : vector<128xf32>
    %60 = vector.multi_reduction <add>, %59, %cst_53 [0] : vector<32x128xf32> to vector<128xf32>
    %61 = vector.shape_cast %60 : vector<128xf32> to vector<1x128xf32>
    %c0_54 = arith.constant 0 : index
    %c0_55 = arith.constant 0 : index
    %62 = vector.load %arg7[%c0_54, %c0_55] : memref<128x8xf32, #tpu.memory_space<vmem>>, vector<128x8xf32>
    %cst_56 = arith.constant dense<0.000000e+00> : vector<1x8xf32>
    %63 = tpu.matmul %58, %62, %cst_56 {dimension_numbers = #tpu.dot_dimension_numbers<[1], [0], [0], [1], [0, 0, 1, 1], [], []>} : vector<1x128xf32>, vector<128x8xf32>, vector<1x8xf32> -> vector<1x8xf32>
    %c0_57 = arith.constant 0 : index
    %c0_58 = arith.constant 0 : index
    %64 = vector.load %arg7[%c0_57, %c0_58] : memref<128x8xf32, #tpu.memory_space<vmem>>, vector<128x8xf32>
    %cst_59 = arith.constant dense<0.000000e+00> : vector<1x8xf32>
    %65 = tpu.matmul %61, %64, %cst_59 {dimension_numbers = #tpu.dot_dimension_numbers<[1], [0], [0], [1], [0, 0, 1, 1], [], []>} : vector<1x128xf32>, vector<128x8xf32>, vector<1x8xf32> -> vector<1x8xf32>
    %cst_60 = arith.constant 0.001953125 : f32
    %66 = vector.broadcast %cst_60 : f32 to vector<1x8xf32>
    %67 = arith.mulf %63, %66 : vector<1x8xf32>
    %cst_61 = arith.constant 0.001953125 : f32
    %68 = vector.broadcast %cst_61 : f32 to vector<1x8xf32>
    %69 = arith.mulf %65, %68 : vector<1x8xf32>
    %70 = arith.mulf %67, %67 : vector<1x8xf32>
    %71 = arith.subf %69, %70 : vector<1x8xf32>
    %c0_62 = arith.constant 0 : index
    %c0_63 = arith.constant 0 : index
    %72 = vector.load %arg5[%c0_62, %c0_63] : memref<1x8xf32, #tpu.memory_space<vmem>>, vector<1x8xf32>
    %cst_64 = arith.constant 9.99999974E-6 : f32
    %73 = vector.broadcast %cst_64 : f32 to vector<1x8xf32>
    %74 = arith.addf %71, %73 : vector<1x8xf32>
    %75 = math.rsqrt %74 : vector<1x8xf32>
    %76 = arith.mulf %72, %75 : vector<1x8xf32>
    %c0_65 = arith.constant 0 : index
    %c0_66 = arith.constant 0 : index
    %77 = vector.load %arg6[%c0_65, %c0_66] : memref<1x8xf32, #tpu.memory_space<vmem>>, vector<1x8xf32>
    %78 = arith.mulf %67, %76 : vector<1x8xf32>
    %79 = arith.subf %77, %78 : vector<1x8xf32>
    %c0_67 = arith.constant 0 : index
    %c0_68 = arith.constant 0 : index
    %80 = vector.load %arg8[%c0_67, %c0_68] : memref<8x128xf32, #tpu.memory_space<vmem>>, vector<8x128xf32>
    %cst_69 = arith.constant dense<0.000000e+00> : vector<1x128xf32>
    %81 = tpu.matmul %76, %80, %cst_69 {dimension_numbers = #tpu.dot_dimension_numbers<[1], [0], [0], [1], [0, 0, 1, 1], [], []>} : vector<1x8xf32>, vector<8x128xf32>, vector<1x128xf32> -> vector<1x128xf32>
    %c0_70 = arith.constant 0 : index
    %c0_71 = arith.constant 0 : index
    %82 = vector.load %arg8[%c0_70, %c0_71] : memref<8x128xf32, #tpu.memory_space<vmem>>, vector<8x128xf32>
    %cst_72 = arith.constant dense<0.000000e+00> : vector<1x128xf32>
    %83 = tpu.matmul %79, %82, %cst_72 {dimension_numbers = #tpu.dot_dimension_numbers<[1], [0], [0], [1], [0, 0, 1, 1], [], []>} : vector<1x8xf32>, vector<8x128xf32>, vector<1x128xf32> -> vector<1x128xf32>
    %84 = vector.broadcast %81 : vector<1x128xf32> to vector<32x128xf32>
    %85 = arith.mulf %56, %84 : vector<32x128xf32>
    %86 = vector.broadcast %83 : vector<1x128xf32> to vector<32x128xf32>
    %87 = arith.addf %85, %86 : vector<32x128xf32>
    %cst_73 = arith.constant 0.000000e+00 : f32
    %88 = vector.broadcast %cst_73 : f32 to vector<32x128xf32>
    %89 = arith.maximumf %87, %88 : vector<32x128xf32>
    %90 = vector.shape_cast %89 : vector<32x128xf32> to vector<2x16x128xf32>
    %c0_74 = arith.constant 0 : index
    %c0_75 = arith.constant 0 : index
    %c0_76 = arith.constant 0 : index
    %91 = vector.load %arg9[%c0_74, %c0_75, %c0_76] : memref<2x16x128xf32, #tpu.memory_space<vmem>>, vector<2x16x128xf32>
    tpu.vector_store %arg9[%c0_74, %c0_75, %c0_76], %90 {strides = array<i32>} : memref<2x16x128xf32, #tpu.memory_space<vmem>>, vector<2x16x128xf32>,
    return
  }
}

</mosaic_0001>

<bundles_post_ra>
// kernel: tpu_custom_call.1
= control target key start
LH: loop header
LB: loop body
LE: loop exit
PB: predicated region body
PF: predicated region fallthrough
CT: control target
= control target key end

     0   :  { %14 = vsyncpa [#allocation4], 0  ;;  %s2204_s0 = inlined_call_operand.vmem [shape: f32[2,18,64], index: 0, kind: input, shape index: {}]   ;;  %s2205_s1 = inlined_call_operand.vmem [shape: f32[192,128], index: 1, kind: input, shape index: {}]   ;;  %s2206_s2 = inlined_call_operand.vmem [shape: f32[1,8], index: 2, kind: input, shape index: {}]   ;;  %s2207_s3 = inlined_call_operand.vmem [shape: f32[1,8], index: 3, kind: input, shape index: {}]   ;;  %s2208_s4 = inlined_call_operand.hbm [shape: f32[384,128], index: 4, kind: input, shape index: {}]   ;;  %s2209_s5 = inlined_call_operand.vmem [shape: f32[1,8], index: 5, kind: input, shape index: {}]   ;;  %s2210_s6 = inlined_call_operand.vmem [shape: f32[1,8], index: 6, kind: input, shape index: {}]   ;;  %s2211_s7 = inlined_call_operand.vmem [shape: f32[128,8], index: 7, kind: input, shape index: {}]   ;;  %s2212_s8 = inlined_call_operand.vmem [shape: f32[8,128], index: 8, kind: input, shape index: {}]   ;;  %s2213_s9 = inlined_call_operand.hbm [shape: f32[2,16,128], index: 9, kind: output, shape index: {}]  }
   0x1   :  { %15 = vsyncpa [#allocation5], 0  ;;  %s1775_s30 = smov [#allocation3]   ;;  %s1727_s13 = scalar_lea.hbm %s2208_s4, 6144 }
   0x2   :  { %s29_s10 = sshll.u32 %s1775_s30, 4  ;;  %p1728_p0 = scmp.ne.s32.totalorder %s2208_s4, %s1727_s13  ;;  %s30_s10 = int_to_ptr.vmem [resolvable:$true] %s29_s10 }
   0x3   :  { %p1731_p1 = scmp.lt.u32.totalorder %s1727_s13, %s2208_s4 }
   0x5   :  { %p1733_p2 = pnand %p1731_p1, %p1728_p0 }
   0x7   :  { %1736 = shalt.err (!%p1733_p2)
}
   0x8   :  { %s1737_s18 = scalar_lea.vmem %s30_s10, 6144  ;;  %p1742_p4 = scmp.lt.s32.totalorder %s30_s10, %s30_s10 }
   0x9   :  { %p1738_p3 = scmp.ne.s32.totalorder %s30_s10, %s1737_s18  ;;  %p1743_p5 = scmp.lt.s32.totalorder %s1737_s18, %s1737_s18 }
   0xb   :  { %p1744_p6 = por %p1743_p5, %p1742_p4 }
   0xd   :  { %p1745_p7 = pnand %p1744_p6, %p1738_p3 }
   0xf   :  { %1748 = shalt.err (!%p1745_p7)
}
  0x10   :  { %s1776_s19 = smov 128   ;;  %s1777_s20 = smov 8  }
  0x11   :  { %35 = dma.hbm_to_vmem [thread:$0]  %s2208_s4, 6144, %s30_s10, [#allocation4], %s1776_s19, %s1776_s19, %s1777_s20  }
  0x12   :  { %1771 = dma.done.wait [#allocation4], 6144  }
  0x13   :  { %1772 = vsyncadd [#allocation4], 4294961152  ;;  %v1778_v0 = vmov 0.0|0.0   ;;  %v51_v1 = vld [vmem:[%s2204_s0 + $0x1] sm:$0xff]  ;;  %v53_v2 = vld [vmem:[%s2204_s0 + $0x19] sm:$0xff]  ;;  %s1779_s27 = smov 64  }
  0x14   :  { %1519 = vmatprep.subr.bf16.mxu0 %v1778_v0  ;;  %1555 = vmatprep.subr.bf16.mxu1 %v1778_v0  ;;  %v80_v3 = vld [vmem:[%s2205_s1] sm:$0xff]  ;;  %v52_v4 = vld [vmem:[%s2204_s0 + $0x9] sm:$0xff]  ;;  %v83_v9 = vld [vmem:[%s2205_s1 + $0x18] sm:$0xff]  ;;  %vm75_vm0 = vcmask 523264   ;;  %vm1780_vm1 = vmmov 0   ;;  %vm391_vm2 = vcmask 64512  }
  0x15   :  { %63 = vrot.lane.b32.xlu0 %v51_v1, %s1779_s27  ;;  %67 = vrot.lane.b32.xlu1 %v53_v2, %s1779_s27  ;;  %v54_v5 = vld [vmem:[%s2204_s0 + $0x21] sm:$0xff]  ;;  %v82_v8 = vld [vmem:[%s2205_s1 + $0x10] sm:$0xff] }
  0x16   :  { %v81_v6 = vld [vmem:[%s2205_s1 + $0x8] sm:$0xff]  ;;  %v1523_v10 = vpack.c.bf16 %v83_v9, %v82_v8  ;;  %v84_v11 = vld [vmem:[%s2205_s1 + $0x20] sm:$0xff]  ;;  %v86_v15 = vld [vmem:[%s2205_s1 + $0x30] sm:$0xff] }
  0x17   :  { %v1520_v7 = vpack.c.bf16 %v81_v6, %v80_v3  ;;  %v85_v12 = vld [vmem:[%s2205_s1 + $0x28] sm:$0xff]  ;;  %v87_v16 = vld [vmem:[%s2205_s1 + $0x38] sm:$0xff]  ;;  %v223_v17 = vld [vmem:[%s2211_s7] sm:$0xff] }
  0x18   :  { %v1526_v13 = vpack.c.bf16 %v85_v12, %v84_v11  ;;  %v55_v14 = vld [vmem:[%s2204_s0 + $0x2] sm:$0xff]  ;;  %v225_v19 = vld [vmem:[%s2211_s7 + $0x10] sm:$0xff]  ;;  %v226_v20 = vld [vmem:[%s2211_s7 + $0x18] sm:$0xff]  ;;  %v1529_v21 = vpack.c.bf16 %v87_v16, %v86_v15 }
  0x19   :  { %65 = vrot.lane.b32.xlu0 %v52_v4, %s1779_s27  ;;  %69 = vrot.lane.b32.xlu1 %v54_v5, %s1779_s27  ;;  %v224_v18 = vld [vmem:[%s2211_s7 + $0x8] sm:$0xff]  ;;  %v88_v23 = vld [vmem:[%s2205_s1 + $0x40] sm:$0xff]  ;;  %v1914_v25 = vpack.c.bf16 %v226_v20, %v225_v19 }
  0x1a   :  { %1521 = vmatpush1.bf16.msra.mxu0 %v1520_v7  ;;  %1173 = vmatprep.mubr.msk.f32.mxu0 %vm75_vm0, %v55_v14  ;;  %v1904_v22 = vpack.c.bf16 %v224_v18, %v223_v17  ;;  %v89_v24 = vld [vmem:[%s2205_s1 + $0x48] sm:$0xff]  ;;  %v90_v27 = vld [vmem:[%s2205_s1 + $0x50] sm:$0xff]  ;;  %v91_v28 = vld [vmem:[%s2205_s1 + $0x58] sm:$0xff]  ;;  %v1781_v18 = vmov 0.0  }
  0x1b   :  { %1522 = vmatprep.subr.bf16.mxu0 %v1778_v0  ;;  %v1532_v26 = vpack.c.bf16 %v89_v24, %v88_v23  ;;  %v1535_v29 = vpack.c.bf16 %v91_v28, %v90_v27  ;;  %v92_v30 = vld [vmem:[%s2205_s1 + $0x60] sm:$0xff]  ;;  %v93_v31 = vld [vmem:[%s2205_s1 + $0x68] sm:$0xff]  ;;  %v94_v33 = vld [vmem:[%s2205_s1 + $0x70] sm:$0xff]  ;;  %1353 = vmatprep.mubr.msk.f32.mxu1 %vm1780_vm1, %v1781_v18  ;;  %558 = vst [vmem:[#allocation2] sm:$0x1] %v1781_v18 }
  0x1c   :  { %1557 = vmatpush3.bf16.msra.mxu1 %v1904_v22  ;;  %v1538_v32 = vpack.c.bf16 %v93_v31, %v92_v30  ;;  %v95_v34 = vld [vmem:[%s2205_s1 + $0x78] sm:$0xff]  ;;  %v96_v36 = vld [vmem:[%s2205_s1 + $0x80] sm:$0xff]  ;;  %v97_v37 = vld [vmem:[%s2205_s1 + $0x88] sm:$0xff]  ;;  %559 = vst [vmem:[#allocation2 + $0x18] sm:$0x1] %v1781_v18 }
  0x1d   :  { %1558 = vmatprep.subr.bf16.mxu1 %v1778_v0  ;;  %v1541_v35 = vpack.c.bf16 %v95_v34, %v94_v33  ;;  %v1544_v38 = vpack.c.bf16 %v97_v37, %v96_v36  ;;  %v98_v39 = vld [vmem:[%s2205_s1 + $0x90] sm:$0xff]  ;;  %v99_v40 = vld [vmem:[%s2205_s1 + $0x98] sm:$0xff]  ;;  %v100_v42 = vld [vmem:[%s2205_s1 + $0xa0] sm:$0xff]  ;;  %560 = vst [vmem:[#allocation2 + $0x11] sm:$0x1] %v1781_v18 }
  0x1e   :  { %1524 = vmatpush1.bf16.msra.mxu0 %v1523_v10  ;;  %v1547_v41 = vpack.c.bf16 %v99_v40, %v98_v39  ;;  %v101_v43 = vld [vmem:[%s2205_s1 + $0xa8] sm:$0xff]  ;;  %v102_v45 = vld [vmem:[%s2205_s1 + $0xb0] sm:$0xff]  ;;  %v103_v46 = vld [vmem:[%s2205_s1 + $0xb8] sm:$0xff]  ;;  %561 = vst [vmem:[#allocation2 + $0x29] sm:$0x1] %v1781_v18 }
  0x1f   :  { %1525 = vmatprep.subr.bf16.mxu0 %v1778_v0  ;;  %v1550_v44 = vpack.c.bf16 %v101_v43, %v100_v42  ;;  %v1553_v47 = vpack.c.bf16 %v103_v46, %v102_v45  ;;  %v47_v48 = vld [vmem:[%s2204_s0] sm:$0xff]  ;;  %v56_v50 = vld [vmem:[%s2204_s0 + $0xa] sm:$0xff]  ;;  %v49_v56 = vld [vmem:[%s2204_s0 + $0x18] sm:$0xff] }
  0x20   :  { %1560 = vmatpush3.bf16.msra.mxu1 %v1914_v25  ;;  %v48_v52 = vld [vmem:[%s2204_s0 + $0x8] sm:$0xff]  ;;  %v57_v55 = vld [vmem:[%s2204_s0 + $0x1a] sm:$0xff]  ;;  %v229_v3 = vld [vmem:[%s2211_s7 + $0x30] sm:$0xff] }
  0x21   :  { %1561 = vmatprep.subr.bf16.mxu1 %v1778_v0  ;;  %v58_v60 = vld [vmem:[%s2204_s0 + $0x22] sm:$0xff]  ;;  %v230_v4 = vld [vmem:[%s2211_s7 + $0x38] sm:$0xff]  ;;  %v233_v9 = vld [vmem:[%s2211_s7 + $0x50] sm:$0xff] }
  0x22   :  { %1527 = vmatpush1.bf16.msra.mxu0 %v1526_v13  ;;  %v50_v61 = vld [vmem:[%s2204_s0 + $0x20] sm:$0xff]  ;;  %v228_v1 = vld [vmem:[%s2211_s7 + $0x28] sm:$0xff]  ;;  %v2013_v5 = vpack.c.bf16 %v230_v4, %v229_v3  ;;  %v234_v10 = vld [vmem:[%s2211_s7 + $0x58] sm:$0xff] }
  0x23   :  { %1528 = vmatprep.subr.bf16.mxu0 %v1778_v0  ;;  %v227_v63 = vld [vmem:[%s2211_s7 + $0x20] sm:$0xff]  ;;  %v232_v7 = vld [vmem:[%s2211_s7 + $0x48] sm:$0xff]  ;;  %v2033_v11 = vpack.c.bf16 %v234_v10, %v233_v9  ;;  %v237_v15 = vld [vmem:[%s2211_s7 + $0x70] sm:$0xff] }
  0x24   :  { %v2003_v2 = vpack.c.bf16 %v228_v1, %v227_v63  ;;  %v231_v6 = vld [vmem:[%s2211_s7 + $0x40] sm:$0xff]  ;;  %v236_v13 = vld [vmem:[%s2211_s7 + $0x68] sm:$0xff]  ;;  %v238_v16 = vld [vmem:[%s2211_s7 + $0x78] sm:$0xff] }
  0x25   :  { %v2023_v8 = vpack.c.bf16 %v232_v7, %v231_v6  ;;  %v235_v12 = vld [vmem:[%s2211_s7 + $0x60] sm:$0xff]  ;;  %v2053_v17 = vpack.c.bf16 %v238_v16, %v237_v15  ;;  %v598_v1 = vld [vmem:[#allocation3 + $0xa0] sm:$0xff]  ;;  %v599_v3 = vld [vmem:[#allocation3 + $0xa8] sm:$0xff] }
  0x26   :  { %1530 = vmatpush1.bf16.msra.mxu0 %v1529_v21  ;;  %1563 = vmatpush3.bf16.msra.mxu1 %v2003_v2  ;;  %v2043_v14 = vpack.c.bf16 %v236_v13, %v235_v12  ;;  %v1611_v4 = vpack.c.bf16 %v599_v3, %v598_v1  ;;  %v582_v6 = vld [vmem:[#allocation3 + $0x20] sm:$0xff]  ;;  %v583_v7 = vld [vmem:[#allocation3 + $0x28] sm:$0xff]  ;;  %v605_v1 = vld [vmem:[#allocation3 + $0xd8] sm:$0xff] }
  0x27   :  { %1531 = vmatprep.subr.bf16.mxu0 %v1778_v0  ;;  %1564 = vmatprep.subr.bf16.mxu1 %v1778_v0  ;;  %v1613_v9 = vpack.c.bf16 %v583_v7, %v582_v6  ;;  %v621_v6 = vld [vmem:[#allocation3 + $0x158] sm:$0xff]  ;;  %v588_v7 = vld [vmem:[#allocation3 + $0x50] sm:$0xff] }
  0x2a   :  { %1533 = vmatpush1.bf16.msra.mxu0 %v1532_v26  ;;  %1566 = vmatpush3.bf16.msra.mxu1 %v2013_v5 }
  0x2b   :  { %1534 = vmatprep.subr.bf16.mxu0 %v1778_v0  ;;  %1567 = vmatprep.subr.bf16.mxu1 %v1778_v0 }
  0x2e   :  { %1536 = vmatpush1.bf16.msra.mxu0 %v1535_v29  ;;  %1569 = vmatpush3.bf16.msra.mxu1 %v2023_v8 }
  0x2f   :  { %1537 = vmatprep.subr.bf16.mxu0 %v1778_v0  ;;  %1570 = vmatprep.subr.bf16.mxu1 %v1778_v0 }
  0x32   :  { %1539 = vmatpush1.bf16.msra.mxu0 %v1538_v32  ;;  %1572 = vmatpush3.bf16.msra.mxu1 %v2033_v11 }
  0x33   :  { %1540 = vmatprep.subr.bf16.mxu0 %v1778_v0  ;;  %1573 = vmatprep.subr.bf16.mxu1 %v1778_v0 }
  0x36   :  { %1542 = vmatpush1.bf16.msra.mxu0 %v1541_v35  ;;  %1575 = vmatpush3.bf16.msra.mxu1 %v2043_v14 }
  0x37   :  { %1543 = vmatprep.subr.bf16.mxu0 %v1778_v0  ;;  %1576 = vmatprep.subr.bf16.mxu1 %v1778_v0 }
  0x3a   :  { %1545 = vmatpush1.bf16.msra.mxu0 %v1544_v38  ;;  %1578 = vmatpush3.bf16.msra.mxu1 %v2053_v17 }
  0x3b   :  { %1546 = vmatprep.subr.bf16.mxu0 %v1778_v0  ;;  %1579 = vmatprep.subr.bf16.mxu1 %v1778_v0 }
  0x3e   :  { %1548 = vmatpush1.bf16.msra.mxu0 %v1547_v41 }
  0x3f   :  { %1549 = vmatprep.subr.bf16.mxu0 %v1778_v0 }
  0x42   :  { %1551 = vmatpush1.bf16.msra.mxu0 %v1550_v44 }
  0x43   :  { %1552 = vmatprep.subr.bf16.mxu0 %v1778_v0 }
  0x46   :  { %1554 = vmatpush1.bf16.msra.mxu0 %v1553_v47 }
  0x47   :  { %1391 = vmatprep.subr.mxu0 %v1781_v18 }
  0x87   :  { %v64_v49 = vpop.permute.xlu0 %63  ;;  %v68_v53 = vpop.permute.xlu1 %67 }
  0x88   :  { %v76_v51 = vsel %vm75_vm0, %v47_v48, %v64_v49  ;;  %v78_v58 = vsel %vm75_vm0, %v49_v56, %v68_v53  ;;  %v595_v53 = vld [vmem:[#allocation3 + $0x88] sm:$0xff] }
  0x89   :  { %181 = vmatmul.mubr.f32.vlgmr.msra.gmra.mrb[0].mxu0 %v76_v51  ;;  %v2106_v51 = vld [vmem:[%s2212_s8] sm:$0xff]  ;;  %v579_v56 = vld [vmem:[#allocation3 + $0x8] sm:$0xff] }
  0x8a   :  { %1174 = vmatprep.mubr.msk.f32.mxu0 %vm75_vm0, %v56_v50  ;;  %1392 = vmatpush3.msra.mxu0 %v2106_v51 }
  0x8b   :  { %v66_v54 = vpop.permute.xlu0 %65  ;;  %v70_v59 = vpop.permute.xlu1 %69  ;;  %1396 = vmatprep.subr.mxu0 %v1781_v18 }
  0x8c   :  { %v77_v57 = vsel %vm75_vm0, %v48_v52, %v66_v54  ;;  %v79_v62 = vsel %vm75_vm0, %v50_v61, %v70_v59  ;;  %v594_v52 = vld [vmem:[#allocation3 + $0x80] sm:$0xff]  ;;  %v597_v59 = vld [vmem:[#allocation3 + $0x98] sm:$0xff]  ;;  %v580_v61 = vld [vmem:[#allocation3 + $0x10] sm:$0xff] }
  0x8d   :  { %186 = vmatmul.mubr.f32.gmra.mrb[2].mxu0 %v77_v57  ;;  %v1603_v54 = vpack.c.bf16 %v595_v53, %v594_v52  ;;  %v585_v52 = vld [vmem:[#allocation3 + $0x38] sm:$0xff] }
  0x8e   :  { %1175 = vmatprep.mubr.msk.f32.mxu0 %vm75_vm0, %v57_v55  ;;  %v578_v55 = vld [vmem:[#allocation3] sm:$0xff] }
  0x8f   :  { %v1605_v57 = vpack.c.bf16 %v579_v56, %v578_v55  ;;  %v603_v55 = vld [vmem:[#allocation3 + $0xc8] sm:$0xff] }
  0x91   :  { %191 = vmatmul.mubr.f32.gmra.mrb[4].mxu0 %v78_v58  ;;  %v596_v58 = vld [vmem:[#allocation3 + $0x90] sm:$0xff] }
  0x92   :  { %1176 = vmatprep.mubr.msk.f32.mxu0 %vm75_vm0, %v58_v60  ;;  %v1607_v60 = vpack.c.bf16 %v597_v59, %v596_v58  ;;  %v619_v58 = vld [vmem:[#allocation3 + $0x148] sm:$0xff]  ;;  %v586_v59 = vld [vmem:[#allocation3 + $0x40] sm:$0xff] }
  0x95   :  { %196 = vmatmul.mubr.f32.gmra.mrb[6].mxu0 %v79_v62  ;;  %v581_v62 = vld [vmem:[#allocation3 + $0x18] sm:$0xff] }
  0x96   :  { %1393 = vmatprep.mubr.msk.f32.mxu0 %vm1780_vm1, %v1781_v18  ;;  %v1609_v63 = vpack.c.bf16 %v581_v62, %v580_v61  ;;  %v587_v61 = vld [vmem:[#allocation3 + $0x48] sm:$0xff] }
  0x97   :  { %v1621_v62 = vpack.c.bf16 %v587_v61, %v586_v59 }
 0x15c   :  { %v2066_v19 = vpop.f32.mrb[0].mxu0 }
 0x15d   :  { %v184_v20 = vpop.f32.mrb[1].mxu0  ;;  %v210_v23 = vmul.f32 %v2066_v19, %v2066_v19 }
 0x160   :  { %v2068_v21 = vpop.f32.mrb[2].mxu0 }
 0x161   :  { %v201_v24 = vadd.f32 %v2068_v21, %v2066_v19  ;;  %v211_v26 = vmul.f32 %v2068_v21, %v2068_v21  ;;  %v189_v27 = vpop.f32.mrb[3].mxu0 }
 0x162   :  { %v383_v27 = vld [vmem:[%s2206_s2] sm:$0x1] }
 0x163   :  { %v214_v28 = vadd.f32 %v211_v26, %v210_v23 }
 0x164   :  { %v2076_v29 = vpop.f32.mrb[4].mxu0 }
 0x165   :  { %v202_v30 = vadd.f32 %v201_v24, %v2076_v29  ;;  %v212_v31 = vmul.f32 %v2076_v29, %v2076_v29  ;;  %v194_v32 = vpop.f32.mrb[5].mxu0 }
 0x167   :  { %v215_v33 = vadd.f32 %v214_v28, %v212_v31  ;;  %v610_v28 = vld [vmem:[#allocation3 + $0x100] sm:$0xff] }
 0x168   :  { %v2081_v34 = vpop.f32.mrb[6].mxu0 }
 0x169   :  { %v203_v35 = vadd.f32 %v202_v30, %v2081_v34  ;;  %v213_v36 = vmul.f32 %v2081_v34, %v2081_v34  ;;  %v199_v37 = vpop.f32.mrb[7].mxu0  ;;  %v611_v30 = vld [vmem:[#allocation3 + $0x108] sm:$0xff] }
 0x16a   :  { %v613_v37 = vld [vmem:[#allocation3 + $0x118] sm:$0xff] }
 0x16b   :  { %v204_v38 = vrot.slane %v203_v35, 4  ;;  %v216_v39 = vadd.f32 %v215_v33, %v213_v36  ;;  %v1635_v33 = vpack.c.bf16 %v611_v30, %v610_v28  ;;  %v612_v36 = vld [vmem:[#allocation3 + $0x110] sm:$0xff] }
 0x16c   :  { %v608_v30 = vld [vmem:[#allocation3 + $0xf0] sm:$0xff] }
 0x16d   :  { %v205_v40 = vadd.f32 %v204_v38, %v203_v35  ;;  %v217_v45 = vrot.slane %v216_v39, 4  ;;  %v387_v35 = vld [vmem:[%s2207_s3] sm:$0x1] }
 0x16f   :  { %v206_v41 = vrot.slane %v205_v40, 2  ;;  %v218_v46 = vadd.f32 %v217_v45, %v216_v39  ;;  %v601_v45 = vld [vmem:[#allocation3 + $0xb8] sm:$0xff] }
 0x171   :  { %v207_v42 = vadd.f32 %v206_v41, %v205_v40  ;;  %v219_v47 = vrot.slane %v218_v46, 2  ;;  %v1639_v40 = vpack.c.bf16 %v613_v37, %v612_v36  ;;  %v614_v41 = vld [vmem:[#allocation3 + $0x120] sm:$0xff]  ;;  %v592_v36 = vld [vmem:[#allocation3 + $0x70] sm:$0xff]  ;;  %v593_v37 = vld [vmem:[#allocation3 + $0x78] sm:$0xff] }
 0x173   :  { %v208_v43 = vrot.slane %v207_v42, 1  ;;  %v220_v48 = vadd.f32 %v219_v47, %v218_v46  ;;  %v616_v47 = vld [vmem:[#allocation3 + $0x130] sm:$0xff] }
 0x175   :  { %v209_v44 = vadd.f32 %v208_v43, %v207_v42  ;;  %v221_v49 = vrot.slane %v220_v48, 1  ;;  %v615_v42 = vld [vmem:[#allocation3 + $0x128] sm:$0xff] }
 0x176   :  { %v1643_v43 = vpack.c.bf16 %v615_v42, %v614_v41 }
 0x177   :  { %1354 = vmatmul.mubr.f32.vlgmr.msra.gmra.mrb[0].mxu1 %v209_v44  ;;  %v222_v50 = vadd.f32 %v221_v49, %v220_v48  ;;  %v600_v44 = vld [vmem:[#allocation3 + $0xb0] sm:$0xff]  ;;  %v617_v48 = vld [vmem:[#allocation3 + $0x138] sm:$0xff] }
 0x178   :  { %1581 = vmatpush3.bf16.msra.mxu1 %v1904_v22  ;;  %1388 = vmatprep.mubr.msk.f32.mxu1 %vm1780_vm1, %v1781_v18  ;;  %v1615_v46 = vpack.c.bf16 %v601_v45, %v600_v44  ;;  %v584_v49 = vld [vmem:[#allocation3 + $0x30] sm:$0xff] }
 0x179   :  { %1582 = vmatprep.subr.bf16.mxu1 %v1778_v0  ;;  %v1617_v53 = vpack.c.bf16 %v585_v52, %v584_v49 }
 0x17c   :  { %1584 = vmatpush3.bf16.msra.mxu1 %v1914_v25 }
 0x17d   :  { %1585 = vmatprep.subr.bf16.mxu1 %v1778_v0 }
 0x180   :  { %1587 = vmatpush3.bf16.msra.mxu1 %v2003_v2 }
 0x181   :  { %1588 = vmatprep.subr.bf16.mxu1 %v1778_v0 }
 0x184   :  { %1590 = vmatpush3.bf16.msra.mxu1 %v2013_v5 }
 0x185   :  { %1591 = vmatprep.subr.bf16.mxu1 %v1778_v0 }
 0x188   :  { %1593 = vmatpush3.bf16.msra.mxu1 %v2023_v8 }
 0x189   :  { %1594 = vmatprep.subr.bf16.mxu1 %v1778_v0 }
 0x18c   :  { %1596 = vmatpush3.bf16.msra.mxu1 %v2033_v11 }
 0x18d   :  { %1597 = vmatprep.subr.bf16.mxu1 %v1778_v0 }
 0x190   :  { %1599 = vmatpush3.bf16.msra.mxu1 %v2043_v14 }
 0x191   :  { %1600 = vmatprep.subr.bf16.mxu1 %v1778_v0 }
 0x194   :  { %1602 = vmatpush3.bf16.msra.mxu1 %v2053_v17 }
 0x195   :  { %1604 = vmatprep.subr.bf16.mxu1 %v1603_v54  ;;  %v602_v54 = vld [vmem:[#allocation3 + $0xc0] sm:$0xff] }
 0x196   :  { %v1619_v56 = vpack.c.bf16 %v603_v55, %v602_v54 }
 0x197   :  { %1389 = vmatmul.mubr.f32.vlgmr.msra.gmra.mrb[2].mxu1 %v222_v50  ;;  %v1647_v50 = vpack.c.bf16 %v617_v48, %v616_v47 }
 0x198   :  { %1606 = vmatpush3.bf16.msra.mxu1 %v1605_v57  ;;  %v618_v57 = vld [vmem:[#allocation3 + $0x140] sm:$0xff] }
 0x199   :  { %1608 = vmatprep.subr.bf16.mxu1 %v1607_v60  ;;  %v1651_v60 = vpack.c.bf16 %v619_v58, %v618_v57 }
 0x19c   :  { %1610 = vmatpush3.bf16.msra.mxu1 %v1609_v63  ;;  %v604_v63 = vld [vmem:[#allocation3 + $0xd0] sm:$0xff] }
 0x19d   :  { %1612 = vmatprep.subr.bf16.mxu1 %v1611_v4  ;;  %v1623_v3 = vpack.c.bf16 %v605_v1, %v604_v63  ;;  %v620_v4 = vld [vmem:[#allocation3 + $0x150] sm:$0xff] }
 0x1a0   :  { %1614 = vmatpush3.bf16.msra.mxu1 %v1613_v9  ;;  %v1655_v9 = vpack.c.bf16 %v621_v6, %v620_v4 }
 0x1a1   :  { %1616 = vmatprep.subr.bf16.mxu1 %v1615_v46 }
 0x1a4   :  { %1618 = vmatpush3.bf16.msra.mxu1 %v1617_v53 }
 0x1a5   :  { %1620 = vmatprep.subr.bf16.mxu1 %v1619_v56 }
 0x1a8   :  { %1622 = vmatpush3.bf16.msra.mxu1 %v1621_v62 }
 0x1a9   :  { %1624 = vmatprep.subr.bf16.mxu1 %v1623_v3 }
 0x24a   :  { %v305_v10 = vpop.f32.mrb[0].mxu1 }
 0x24b   :  { %v1355_v12 = vpop.f32.mrb[1].mxu1  ;;  %v379_v13 = vmul.f32 0.001953125, %v305_v10  ;;  %v589_v10 = vld [vmem:[#allocation3 + $0x58] sm:$0xff] }
 0x24c   :  { %v1625_v12 = vpack.c.bf16 %v589_v10, %v588_v7 }
 0x24d   :  { %v381_v16 = vmul.f32 %v379_v13, %v379_v13 }
 0x24e   :  { %1626 = vmatpush3.bf16.msra.mxu1 %v1625_v12 }
 0x26a   :  { %v375_v15 = vpop.f32.mrb[2].mxu1 }
 0x26b   :  { %v380_v20 = vmul.f32 0.001953125, %v375_v15  ;;  %v1390_v23 = vpop.f32.mrb[3].mxu1  ;;  %v607_v15 = vld [vmem:[#allocation3 + $0xe8] sm:$0xff] }
 0x26c   :  { %v623_v23 = vld [vmem:[#allocation3 + $0x168] sm:$0xff] }
 0x26d   :  { %v382_v24 = vsub.f32 %v380_v20, %v381_v16  ;;  %v622_v20 = vld [vmem:[#allocation3 + $0x160] sm:$0xff] }
 0x26f   :  { %v384_v26 = vadd.f32 1e-05, %v382_v24  ;;  %v590_v24 = vld [vmem:[#allocation3 + $0x60] sm:$0xff] }
 0x271   :  { %1723 = vrsqrt.f32 %v384_v26  ;;  %v1659_v26 = vpack.c.bf16 %v623_v23, %v622_v20 }
 0x27b   :  { %v1724_v31 = vpop.eup %1723 }
 0x27c   :  { %v386_v32 = vmul.f32 %v1724_v31, %v383_v27  ;;  %v591_v27 = vld [vmem:[#allocation3 + $0x68] sm:$0xff]  ;;  %v609_v31 = vld [vmem:[#allocation3 + $0xf8] sm:$0xff] }
 0x27d   :  { %v1629_v28 = vpack.c.bf16 %v591_v27, %v590_v24 }
 0x27e   :  { %1394 = vmatmul.mubr.msk.f32.vlgmr.msra.gmra.mrb[8].mxu0 %vm391_vm2, %v386_v32  ;;  %v388_v38 = vmul.f32 %v386_v32, %v379_v13  ;;  %v606_v13 = vld [vmem:[#allocation3 + $0xe0] sm:$0xff]  ;;  %v624_v32 = vld [vmem:[#allocation3 + $0x170] sm:$0xff] }
 0x27f   :  { %1397 = vmatpush3.msra.mxu0 %v2106_v51  ;;  %1398 = vmatprep.mubr.msk.f32.mxu0 %vm1780_vm1, %v1781_v18  ;;  %v1627_v16 = vpack.c.bf16 %v607_v15, %v606_v13 }
 0x280   :  { %v389_v39 = vsub.f32 %v387_v35, %v388_v38  ;;  %1636 = vmatprep.subr.bf16.mxu0 %v1635_v33  ;;  %v625_v35 = vld [vmem:[#allocation3 + $0x178] sm:$0xff] }
 0x281   :  { %1628 = vmatprep.subr.bf16.mxu1 %v1627_v16  ;;  %v1663_v38 = vpack.c.bf16 %v625_v35, %v624_v32 }
 0x282   :  { %1399 = vmatmul.mubr.msk.f32.vlgmr.msra.gmra.mrb[10].mxu0 %vm391_vm2, %v389_v39  ;;  %1630 = vmatpush3.bf16.msra.mxu1 %v1629_v28  ;;  %v1633_v39 = vpack.c.bf16 %v593_v37, %v592_v36 }
 0x283   :  { %1638 = vmatpush3.bf16.msra.mxu0 %v1635_v33  ;;  %v1631_v33 = vpack.c.bf16 %v609_v31, %v608_v30 }
 0x284   :  { %1640 = vmatprep.subr.bf16.mxu0 %v1639_v40 }
 0x285   :  { %1632 = vmatprep.subr.bf16.mxu1 %v1631_v33 }
 0x286   :  { %1634 = vmatpush3.bf16.msra.mxu1 %v1633_v39 }
 0x287   :  { %1642 = vmatpush3.bf16.msra.mxu0 %v1639_v40  ;;  %1667 = vmatprep.subr.bf16.mxu1 %v1778_v0  ;;  %v538_v40 = vlaneseq }
 0x288   :  { %1644 = vmatprep.subr.bf16.mxu0 %v1643_v43 }
 0x289   :  { %v539_v41 = vshrl.u32 %v538_v40, 7 }
 0x28b   :  { %1646 = vmatpush3.bf16.msra.mxu0 %v1643_v43  ;;  %v2123_v42 = vsub.s32 0, %v539_v41 }
 0x28c   :  { %1648 = vmatprep.subr.bf16.mxu0 %v1647_v50 }
 0x28f   :  { %1650 = vmatpush3.bf16.msra.mxu0 %v1647_v50 }
 0x290   :  { %1652 = vmatprep.subr.bf16.mxu0 %v1651_v60 }
 0x293   :  { %1654 = vmatpush3.bf16.msra.mxu0 %v1651_v60 }
 0x294   :  { %1656 = vmatprep.subr.bf16.mxu0 %v1655_v9 }
 0x297   :  { %1658 = vmatpush3.bf16.msra.mxu0 %v1655_v9 }
 0x298   :  { %1660 = vmatprep.subr.bf16.mxu0 %v1659_v26 }
 0x29b   :  { %1662 = vmatpush3.bf16.msra.mxu0 %v1659_v26 }
 0x29c   :  { %1664 = vmatprep.subr.bf16.mxu0 %v1663_v38 }
 0x29f   :  { %1666 = vmatpush3.bf16.msra.mxu0 %v1663_v38 }
 0x2a0   :  { %1691 = vmatprep.subr.bf16.mxu0 %v1778_v0 }
 0x351   :  { %v461_v43 = vpop.f32.mrb[8].mxu0 }
 0x352   :  { %v541_v44 = vrot.slane %v461_v43, %v2123_v42  ;;  %v1395_v45 = vpop.f32.mrb[9].mxu0 }
 0x354   :  { %v542_v46 = vmul.f32 %v541_v44, %v2066_v19  ;;  %v543_v47 = vmul.f32 %v541_v44, %v2068_v21  ;;  %v544_v48 = vmul.f32 %v541_v44, %v2076_v29  ;;  %v545_v49 = vmul.f32 %v541_v44, %v2081_v34 }
 0x355   :  { %v534_v50 = vpop.f32.mrb[10].mxu0 }
 0x356   :  { %v549_v52 = vrot.slane %v534_v50, %v2123_v42  ;;  %v1400_v53 = vpop.f32.mrb[11].mxu0 }
 0x358   :  { %v550_v54 = vadd.f32 %v549_v52, %v542_v46  ;;  %v551_v55 = vadd.f32 %v549_v52, %v543_v47  ;;  %v552_v56 = vadd.f32 %v549_v52, %v544_v48  ;;  %v553_v57 = vadd.f32 %v549_v52, %v545_v49 }
 0x35a   :  { %v554_v58 = vmax.f32 %v550_v54, 0.0  ;;  %v555_v59 = vmax.f32 %v551_v55, 0.0  ;;  %v556_v60 = vmax.f32 %v552_v56, 0.0  ;;  %v557_v61 = vmax.f32 %v553_v57, 0.0 }
 0x35c   :  { %562 = vst [vmem:[#allocation2 + $0x1] sm:$0xff] %v554_v58  ;;  %563 = vst [vmem:[#allocation2 + $0x9] sm:$0xff] %v555_v59  ;;  %690 = vmatprep.mubr.f32.mxu1 %v554_v58 }
 0x35d   :  { %564 = vst [vmem:[#allocation2 + $0x19] sm:$0xff] %v556_v60  ;;  %565 = vst [vmem:[#allocation2 + $0x21] sm:$0xff] %v557_v61 }
 0x363   :  { %v574_v19 = vld [vmem:[#allocation2 + $0x2] sm:$0xff]  ;;  %v575_v29 = vld [vmem:[#allocation2 + $0xa] sm:$0xff] }
 0x364   :  { %v566_v21 = vld [vmem:[#allocation2] sm:$0xff]  ;;  %1433 = vmatprep.mubr.f32.mxu0 %v574_v19  ;;  %v567_v62 = vld [vmem:[#allocation2 + $0x8] sm:$0xff]  ;;  %v568_v1 = vld [vmem:[#allocation2 + $0x18] sm:$0xff] }
 0x365   :  { %691 = vmatmul.mubr.f32.vlgmr.msra.gmra.mrb[4].mxu1 %v566_v21  ;;  %1434 = vmatmul.mubr.f32.vlgmr.msra.gmra.mrb[12].mxu0 %v575_v29  ;;  %v576_v34 = vld [vmem:[#allocation2 + $0x1a] sm:$0xff]  ;;  %v577_v63 = vld [vmem:[#allocation2 + $0x22] sm:$0xff] }
 0x366   :  { %695 = vmatprep.mubr.f32.mxu1 %v555_v59  ;;  %1436 = vmatprep.mubr.f32.mxu0 %v576_v34 }
 0x367   :  { %1669 = vmatpush3.bf16.msra.mxu1 %v1904_v22  ;;  %1693 = vmatpush3.bf16.msra.mxu0 %v1904_v22  ;;  %v569_v22 = vld [vmem:[#allocation2 + $0x20] sm:$0xff] }
 0x368   :  { %1670 = vmatprep.subr.bf16.mxu1 %v1778_v0  ;;  %1694 = vmatprep.subr.bf16.mxu0 %v1778_v0 }
 0x369   :  { %696 = vmatmul.mubr.f32.gmra.mrb[6].mxu1 %v567_v62  ;;  %1437 = vmatmul.mubr.f32.gmra.mrb[14].mxu0 %v577_v63 }
 0x36a   :  { %700 = vmatprep.mubr.f32.mxu1 %v556_v60  ;;  %1506 = vmatprep.mubr.msk.f32.mxu0 %vm1780_vm1, %v1781_v18  ;;  %v978_v60 = vld [vmem:[%s2209_s5] sm:$0x1]  ;;  %s1782_s5 = smov [#allocation6]  }
 0x36b   :  { %1672 = vmatpush3.bf16.msra.mxu1 %v1914_v25  ;;  %1696 = vmatpush3.bf16.msra.mxu0 %v1914_v25 }
 0x36c   :  { %1673 = vmatprep.subr.bf16.mxu1 %v1778_v0  ;;  %1697 = vmatprep.subr.bf16.mxu0 %v1778_v0 }
 0x36d   :  { %701 = vmatmul.mubr.f32.gmra.mrb[8].mxu1 %v568_v1 }
 0x36e   :  { %705 = vmatprep.mubr.f32.mxu1 %v557_v61 }
 0x36f   :  { %1675 = vmatpush3.bf16.msra.mxu1 %v2003_v2  ;;  %1699 = vmatpush3.bf16.msra.mxu0 %v2003_v2 }
 0x370   :  { %1676 = vmatprep.subr.bf16.mxu1 %v1778_v0  ;;  %1700 = vmatprep.subr.bf16.mxu0 %v1778_v0 }
 0x371   :  { %706 = vmatmul.mubr.f32.gmra.mrb[10].mxu1 %v569_v22 }
 0x372   :  { %1471 = vmatprep.mubr.msk.f32.mxu1 %vm1780_vm1, %v1781_v18 }
 0x373   :  { %1678 = vmatpush3.bf16.msra.mxu1 %v2013_v5  ;;  %1702 = vmatpush3.bf16.msra.mxu0 %v2013_v5 }
 0x374   :  { %1679 = vmatprep.subr.bf16.mxu1 %v1778_v0  ;;  %1703 = vmatprep.subr.bf16.mxu0 %v1778_v0 }
 0x377   :  { %1681 = vmatpush3.bf16.msra.mxu1 %v2023_v8  ;;  %1705 = vmatpush3.bf16.msra.mxu0 %v2023_v8 }
 0x378   :  { %1682 = vmatprep.subr.bf16.mxu1 %v1778_v0  ;;  %1706 = vmatprep.subr.bf16.mxu0 %v1778_v0 }
 0x37b   :  { %1684 = vmatpush3.bf16.msra.mxu1 %v2033_v11  ;;  %1708 = vmatpush3.bf16.msra.mxu0 %v2033_v11 }
 0x37c   :  { %1685 = vmatprep.subr.bf16.mxu1 %v1778_v0  ;;  %1709 = vmatprep.subr.bf16.mxu0 %v1778_v0 }
 0x37f   :  { %1687 = vmatpush3.bf16.msra.mxu1 %v2043_v14  ;;  %1711 = vmatpush3.bf16.msra.mxu0 %v2043_v14 }
 0x380   :  { %1688 = vmatprep.subr.bf16.mxu1 %v1778_v0  ;;  %1712 = vmatprep.subr.bf16.mxu0 %v1778_v0 }
 0x383   :  { %1690 = vmatpush3.bf16.msra.mxu1 %v2053_v17  ;;  %1714 = vmatpush3.bf16.msra.mxu0 %v2053_v17 }
 0x384   :  { %1509 = vmatprep.subr.mxu1 %v1781_v18  ;;  %1514 = vmatprep.subr.mxu0 %v1781_v18 }
 0x438   :  { %v1251_v25 = vpop.f32.mrb[4].mxu1  ;;  %v1435_v2 = vpop.f32.mrb[12].mxu0 }
 0x439   :  { %v1252_v5 = vpop.f32.mrb[5].mxu1  ;;  %v777_v11 = vpop.f32.mrb[13].mxu0 }
 0x43a   :  { %v1253_v8 = vadd.f32 %v1252_v5, %v1251_v25 }
 0x43c   :  { %v2167_v3 = vadd.f32 %v1253_v8, %v777_v11  ;;  %v1254_v14 = vpop.f32.mrb[6].mxu1  ;;  %v1438_v4 = vpop.f32.mrb[14].mxu0 }
 0x43d   :  { %v1255_v6 = vpop.f32.mrb[7].mxu1  ;;  %v787_v0 = vpop.f32.mrb[15].mxu0 }
 0x43e   :  { %v1256_v7 = vadd.f32 %v1255_v6, %v1254_v14  ;;  %v805_v23 = vmul.f32 %v2167_v3, %v2167_v3 }
 0x440   :  { %v783_v9 = vadd.f32 %v1435_v2, %v1256_v7  ;;  %v1257_v10 = vpop.f32.mrb[8].mxu1 }
 0x441   :  { %v1258_v12 = vpop.f32.mrb[9].mxu1 }
 0x442   :  { %v1259_v17 = vadd.f32 %v1258_v12, %v1257_v10  ;;  %v806_v13 = vmul.f32 %v783_v9, %v783_v9  ;;  %v796_v24 = vadd.f32 %v783_v9, %v2167_v3 }
 0x444   :  { %v788_v15 = vadd.f32 %v1259_v17, %v787_v0  ;;  %v1260_v16 = vpop.f32.mrb[10].mxu1  ;;  %v809_v28 = vadd.f32 %v806_v13, %v805_v23 }
 0x445   :  { %v1261_v20 = vpop.f32.mrb[11].mxu1 }
 0x446   :  { %v807_v26 = vmul.f32 %v788_v15, %v788_v15  ;;  %v1262_v27 = vadd.f32 %v1261_v20, %v1260_v16  ;;  %v797_v30 = vadd.f32 %v796_v24, %v788_v15 }
 0x448   :  { %v793_v31 = vadd.f32 %v1438_v4, %v1262_v27  ;;  %v810_v32 = vadd.f32 %v809_v28, %v807_v26 }
 0x44a   :  { %v798_v33 = vadd.f32 %v797_v30, %v793_v31  ;;  %v808_v35 = vmul.f32 %v793_v31, %v793_v31 }
 0x44c   :  { %v799_v36 = vrot.slane %v798_v33, 4  ;;  %v811_v37 = vadd.f32 %v810_v32, %v808_v35 }
 0x44e   :  { %v800_v38 = vadd.f32 %v799_v36, %v798_v33  ;;  %v812_v39 = vrot.slane %v811_v37, 4 }
 0x450   :  { %v801_v40 = vrot.slane %v800_v38, 2  ;;  %v813_v41 = vadd.f32 %v812_v39, %v811_v37 }
 0x452   :  { %v802_v43 = vadd.f32 %v801_v40, %v800_v38  ;;  %v814_v44 = vrot.slane %v813_v41, 2 }
 0x454   :  { %v803_v45 = vrot.slane %v802_v43, 1  ;;  %v815_v46 = vadd.f32 %v814_v44, %v813_v41 }
 0x456   :  { %v804_v47 = vadd.f32 %v803_v45, %v802_v43  ;;  %v816_v48 = vrot.slane %v815_v46, 1 }
 0x458   :  { %1472 = vmatmul.mubr.f32.vlgmr.msra.gmra.mrb[12].mxu1 %v804_v47  ;;  %v817_v49 = vadd.f32 %v816_v48, %v815_v46 }
 0x459   :  { %1510 = vmatpush3.msra.mxu1 %v2106_v51  ;;  %1511 = vmatprep.mubr.msk.f32.mxu1 %vm1780_vm1, %v1781_v18 }
 0x45a   :  { %1507 = vmatmul.mubr.f32.vlgmr.msra.gmra.mrb[16].mxu0 %v817_v49 }
 0x45b   :  { %1515 = vmatpush3.msra.mxu0 %v2106_v51  ;;  %1516 = vmatprep.mubr.msk.f32.mxu0 %vm1780_vm1, %v1781_v18  ;;  %v982_v18 = vld [vmem:[%s2210_s6] sm:$0x1]  ;;  %s1161_s6 = sshll.u32 %s1782_s5, 4  ;;  %s1162_s6 = int_to_ptr.vmem [resolvable:$true] %s1161_s6 }
 0x45c   :  { %s1749_s29 = scalar_lea.vmem %s1162_s6, 512  ;;  %p1754_p9 = scmp.lt.s32.totalorder %s1162_s6, %s1162_s6 }
 0x45d   :  { %p1750_p8 = scmp.ne.s32.totalorder %s1162_s6, %s1749_s29  ;;  %p1755_p10 = scmp.lt.s32.totalorder %s1749_s29, %s1749_s29 }
 0x45f   :  { %p1756_p11 = por %p1755_p10, %p1754_p9 }
 0x461   :  { %p1757_p12 = pnand %p1756_p11, %p1750_p8 }
 0x52b   :  { %v900_v50 = vpop.f32.mrb[12].mxu1 }
 0x52c   :  { %v974_v52 = vmul.f32 0.001953125, %v900_v50  ;;  %v1473_v53 = vpop.f32.mrb[13].mxu1 }
 0x52d   :  { %v970_v54 = vpop.f32.mrb[16].mxu0 }
 0x52e   :  { %v976_v55 = vmul.f32 %v974_v52, %v974_v52  ;;  %v975_v56 = vmul.f32 0.001953125, %v970_v54  ;;  %v1508_v57 = vpop.f32.mrb[17].mxu0 }
 0x530   :  { %v977_v58 = vsub.f32 %v975_v56, %v976_v55 }
 0x532   :  { %v979_v59 = vadd.f32 1e-05, %v977_v58 }
 0x534   :  { %1725 = vrsqrt.f32 %v979_v59 }
 0x53e   :  { %v1726_v61 = vpop.eup %1725 }
 0x53f   :  { %v981_v19 = vmul.f32 %v1726_v61, %v978_v60 }
 0x541   :  { %1512 = vmatmul.mubr.msk.f32.vlgmr.msra.gmra.mrb[14].mxu1 %vm391_vm2, %v981_v19  ;;  %v983_v51 = vmul.f32 %v981_v19, %v974_v52 }
 0x543   :  { %v984_v21 = vsub.f32 %v982_v18, %v983_v51 }
 0x545   :  { %1517 = vmatmul.mubr.msk.f32.vlgmr.msra.gmra.mrb[18].mxu0 %vm391_vm2, %v984_v21 }
 0x614   :  { %v1055_v29 = vpop.f32.mrb[14].mxu1 }
 0x615   :  { %v1135_v34 = vrot.slane %v1055_v29, %v2123_v42  ;;  %v1513_v62 = vpop.f32.mrb[15].mxu1 }
 0x617   :  { %v1136_v63 = vmul.f32 %v1135_v34, %v2167_v3  ;;  %v1137_v22 = vmul.f32 %v1135_v34, %v783_v9  ;;  %v1138_v25 = vmul.f32 %v1135_v34, %v788_v15  ;;  %v1139_v2 = vmul.f32 %v1135_v34, %v793_v31 }
 0x618   :  { %v1128_v1 = vpop.f32.mrb[18].mxu0 }
 0x619   :  { %v1143_v5 = vrot.slane %v1128_v1, %v2123_v42  ;;  %v1518_v8 = vpop.f32.mrb[19].mxu0 }
 0x61b   :  { %v1144_v11 = vadd.f32 %v1143_v5, %v1136_v63  ;;  %v1145_v14 = vadd.f32 %v1143_v5, %v1137_v22  ;;  %v1146_v4 = vadd.f32 %v1143_v5, %v1138_v25  ;;  %v1147_v6 = vadd.f32 %v1143_v5, %v1139_v2 }
 0x61d   :  { %v1148_v7 = vmax.f32 %v1144_v11, 0.0  ;;  %v1149_v0 = vmax.f32 %v1145_v14, 0.0  ;;  %v1150_v10 = vmax.f32 %v1146_v4, 0.0  ;;  %v1151_v12 = vmax.f32 %v1147_v6, 0.0 }
 0x61f   :  { %1152 = vst [vmem:[#allocation6] sm:$0xff] %v1148_v7  ;;  %1153 = vst [vmem:[#allocation6 + $0x8] sm:$0xff] %v1149_v0 }
 0x620   :  { %1154 = vst [vmem:[#allocation6 + $0x10] sm:$0xff] %v1150_v10  ;;  %1155 = vst [vmem:[#allocation6 + $0x18] sm:$0xff] %v1151_v12 }
 0x621   :  { %1760 = shalt.err (!%p1757_p12)
}
 0x622   :  { %s1761_s11 = scalar_lea.hbm %s2213_s9, 512 }
 0x623   :  { %p1762_p13 = scmp.ne.s32.totalorder %s2213_s9, %s1761_s11  ;;  %p1765_p0 = scmp.lt.u32.totalorder %s1761_s11, %s2213_s9 }
 0x625   :  { %p1767_p1 = pnand %p1765_p0, %p1762_p13 }
 0x627   :  { %1770 = shalt.err (!%p1767_p1)
}
 0x628   :  { %1167 = dma.vmem_to_hbm [thread:$0]  %s1162_s6, 512, %s2213_s9, [#allocation5], %s1776_s19, %s1776_s19, %s1777_s20  }
 0x629   :  { %1773 = dma.done.wait [#allocation5], 512  }
 0x62a   :  { %1774 = vsyncadd [#allocation5], 4294966784 }
 0x62b   :  { %1171 = vsyncpa [#allocation4], 1 }
 0x62c   :  { %1172 = vsyncpa [#allocation5], 1 }

</bundles_post_ra>
